<compile_context>
chip_gen: v7x
topology: tpu7x:2x2x1
jax: 0.10.0
libtpu: 0.0.40
codegen_flags: <defaults>
</compile_context>

<pallas_src>
import functools

import jax
import jax.numpy as jnp
from jax.experimental import pallas as pl
from jax.experimental.pallas import tpu as pltpu


LABELS = ('pe_present_on_image', 'negative_exam_for_pe', 'indeterminate',
          'chronic_pe', 'acute_and_chronic_pe', 'central_pe', 'leftsided_pe',
          'rightsided_pe', 'rv_lv_ratio_gte_1', 'rv_lv_ratio_lt_1')


# --------------------------------------------------------------------------------------
# Fused kernel: TCN (all TemporalBlocks) + linear_pe + 9 attention heads + max pool +
# per-label Linear(2*hidden, 1)
# --------------------------------------------------------------------------------------
def _fused_net_kernel(block_cfgs, n_att, *refs):
    """Per grid step (one batch tile):
      x_ref    (TB, L, C0)      mask_ref (TB, L)
      per block: w1 (k*Cin, Cout), c1 (1, Cout), w2 (k*Cout, Cout), c2 (1, Cout),
                 [wd (Cin, Cout), bd (1, Cout)]       (weight_norm + eval BN folded)
      wcomb (F, 2N+1)  = [att weights | pe weight | att-pool head weights]
      battT (L, N)     attention biases (transposed)
      whmaxT (F, N)    max-pool half of the per-label head weights
      bhead (1, N)     per-label head biases
      bpe   (1, 1)     pe head bias, SMEM scalar
      outputs: pe (TB, L, 1), lab (TB, N), alpha (TB, L, N)
    """
    refs = list(refs)
    x_ref = refs.pop(0)
    mask_ref = refs.pop(0)
    blk_refs = []
    for cfg in block_cfgs:
        n = 6 if cfg['has_ds'] else 4
        blk_refs.append(refs[:n])
        refs = refs[n:]
    (wcomb_ref, battT_ref, whmaxT_ref, bhead_ref, bpe_ref,
     pe_ref, lab_ref, alpha_ref) = refs

    TB, L, _ = x_ref.shape
    N = n_att

    h = x_ref[...]                                             # (TB, L, C0)

    # ---------------- TemporalConvNet: all blocks, h stays in VMEM ---------------------
    for cfg, br in zip(block_cfgs, blk_refs):
        k, d = cfg['ksize'], cfg['dilation']
        p = (k - 1) * d
        if cfg['has_ds']:
            w1_ref, c1_ref, w2_ref, c2_ref, wd_ref, bd_ref = br
        else:
            w1_ref, c1_ref, w2_ref, c2_ref = br
        cin = h.shape[2]
        cout = c1_ref.shape[1]

        def causal_conv_relu(v, w_ref, c_ref, k=k, d=d, p=p, cout=cout):
            # im2col: column block j holds the input shifted by (k-1-j)*d (causal,
            # zero-padded on the left) -> one (TB*L, k*Cv) x (k*Cv, Cout) MXU matmul.
            cv = v.shape[2]
            if p > 0:
                vp = jnp.concatenate(
                    [jnp.zeros((TB, p, cv), jnp.float32), v], axis=1)   # (TB, L+p, Cv)
            else:
                vp = v
            col = jnp.concatenate([vp[:, j * d:j * d + L, :] for j in range(k)],
                                  axis=2)                               # (TB, L, k*Cv)
            y = jnp.dot(col.reshape(TB * L, k * cv), w_ref[...],
                        preferred_element_type=jnp.float32)             # (TB*L, Cout)
            # Dropout = identity in eval mode.
            return jnp.maximum(y + c_ref[...], 0.0).reshape(TB, L, cout)

        h1 = causal_conv_relu(h, w1_ref, c1_ref)     # conv1 (WN+BN folded) + chomp + ReLU
        h2 = causal_conv_relu(h1, w2_ref, c2_ref)    # conv2 (WN+BN folded) + chomp + ReLU
        if cfg['has_ds']:                            # 1x1 downsample residual
            res = (jnp.dot(h.reshape(TB * L, cin), wd_ref[...],
                           preferred_element_type=jnp.float32)
                   + bd_ref[...]).reshape(TB, L, cout)
        else:
            res = h
        h = jnp.maximum(h2 + res, 0.0)               # residual + final ReLU

    # ---------------- Heads: one combined (TB*L, F) x (F, 2N+1) matmul -----------------
    F = h.shape[2]
    hf = h.reshape(TB * L, F)
    big = jnp.dot(hf, wcomb_ref[...], preferred_element_type=jnp.float32)
    big3 = big.reshape(TB, L, 2 * N + 1)

    # 'pe_present_on_image' : Linear(F, 1) per position (folded into the matmul).
    pe_ref[...] = big3[:, :, N:N + 1] + bpe_ref[0, 0]

    # Nine attention heads at once.  NOTE: mask is applied AFTER exp and alpha is NOT
    # renormalized; epsilon is added AFTER the divide -- faithful to the PyTorch module.
    e = jnp.tanh(big3[:, :, :N] + battT_ref[...])               # (TB, L, N)
    a = jnp.exp(e) * mask_ref[...][:, :, None]                  # (TB, L, N)
    denom = jnp.sum(a, axis=1, keepdims=True)                   # (TB, 1, N)
    alpha = a / denom + 1e-10
    alpha_ref[...] = alpha

    # Per-label Linear(cat([max_pool, att_pool]), 1): att-pool half via the folded
    # projection (no (TB, N, F) intermediate), max-pool half via one small matmul.
    t_att = jnp.sum(alpha * big3[:, :, N + 1:], axis=1)         # (TB, N)
    max_pool = jnp.max(h, axis=1)                               # (TB, F)
    t_max = jnp.dot(max_pool, whmaxT_ref[...],
                    preferred_element_type=jnp.float32)         # (TB, N)
    lab_ref[...] = t_max + t_att + bhead_ref[...]


def _pick_batch_tile(B, L, min_rows=256):
    """Smallest batch tile whose M (= tb*L) fills an MXU pass; honors the (8,128)
    rule for 2-D blocks (tb % 8 == 0) and yields multiple 'parallel' grid steps
    (v7x has 2 TensorCores).  Falls back to the whole batch for tiny inputs."""
    for tb in range(1, B):
        if B % tb == 0 and tb % 8 == 0 and tb * L >= min_rows:
            return tb
    return B


def pe_feature_sequential_net_forward(x, mask, params, *, batch_tile=None):
    """x: (B, L, C0) f32, mask: (B, L) f32 -> (logits_dict, alphas_dict), eval mode."""
    B, L, C0 = x.shape
    hp = params['heads']
    N = hp['bhead'].shape[1]
    F = hp['whmaxT'].shape[0]
    tb = batch_tile if batch_tile is not None else _pick_batch_tile(B, L)
    assert B % tb == 0

    block_cfgs = []
    in_specs = [
        pl.BlockSpec((tb, L, C0), lambda b: (b, 0, 0)),            # x (batch tile)
        pl.BlockSpec((tb, L), lambda b: (b, 0)),                   # mask (lane-dense)
    ]
    args = [x, mask]
    for blk in params['tcn']:
        k = blk['ksize']
        cout = blk['c1'].shape[1]
        cin = blk['w1'].shape[0] // k
        has_ds = 'wd' in blk
        block_cfgs.append(dict(ksize=k, dilation=blk['dilation'], has_ds=has_ds))
        in_specs += [
            pl.BlockSpec((k * cin, cout), lambda b: (0, 0)),       # conv1 im2col weight
            pl.BlockSpec((1, cout), lambda b: (0, 0)),             # conv1 bias (BN folded)
            pl.BlockSpec((k * cout, cout), lambda b: (0, 0)),      # conv2 im2col weight
            pl.BlockSpec((1, cout), lambda b: (0, 0)),             # conv2 bias (BN folded)
        ]
        args += [blk['w1'], blk['c1'], blk['w2'], blk['c2']]
        if has_ds:
            in_specs += [pl.BlockSpec((cin, cout), lambda b: (0, 0)),   # 1x1 downsample W
                         pl.BlockSpec((1, cout), lambda b: (0, 0))]     # 1x1 downsample b
            args += [blk['wd'], blk['bd']]
    in_specs += [
        pl.BlockSpec((F, 2 * N + 1), lambda b: (0, 0)),            # [att | pe | att-pool] W
        pl.BlockSpec((L, N), lambda b: (0, 0)),                    # attention biases (L, N)
        pl.BlockSpec((F, N), lambda b: (0, 0)),                    # head W, max-pool half
        pl.BlockSpec((1, N), lambda b: (0, 0)),                    # head biases
        pl.BlockSpec(memory_space=pltpu.MemorySpace.SMEM),         # pe bias (scalar)
    ]
    args += [hp['wcomb'], hp['battT'], hp['whmaxT'], hp['bhead'], hp['bpe']]

    kern = functools.partial(_fused_net_kernel, tuple(block_cfgs), N)
    pe, lab, alphas = pl.pallas_call(
        kern,
        out_shape=(jax.ShapeDtypeStruct((B, L, 1), jnp.float32),   # linear_pe logits
                   jax.ShapeDtypeStruct((B, N), jnp.float32),      # 9 per-label logits
                   jax.ShapeDtypeStruct((B, L, N), jnp.float32)),  # 9 attention maps
        grid_spec=pltpu.PrefetchScalarGridSpec(
            num_scalar_prefetch=0,
            grid=(B // tb,),
            in_specs=in_specs,
            out_specs=[pl.BlockSpec((tb, L, 1), lambda b: (b, 0, 0)),
                       pl.BlockSpec((tb, N), lambda b: (b, 0)),
                       pl.BlockSpec((tb, L, N), lambda b: (b, 0, 0))],
        ),
        compiler_params=pltpu.CompilerParams(
            dimension_semantics=("parallel",),
            vmem_limit_bytes=48 * 1024 * 1024),   # headroom on v7x's 64 MiB VMEM
    )(*args)

    logits = {'pe_present_on_image': pe}          # already (B, L, 1)
    alphas_dict = {}
    for i, label in enumerate(LABELS[1:]):
        logits[label] = lab[:, i:i + 1]
        alphas_dict[label] = alphas[:, :, i]
    return logits, alphas_dict


# --------------------------------------------------------------------------------------
# Parameters: raw (PyTorch-layout) init + host-side folding into kernel layout
# --------------------------------------------------------------------------------------
def init_params(key, c_in, hidden, seq_len, ksize=3, levels=2):
    """Raw parameters: weight_norm (v, g) + conv bias, BN running stats, head weights."""
    keys = iter(jax.random.split(key, 64))

    def nrm(shape, s=0.1):
        return s * jax.random.normal(next(keys), shape, jnp.float32)

    tcn = []
    for lvl in range(levels):
        cin = c_in if lvl == 0 else hidden
        blk = dict(
            dilation=2 ** lvl, ksize=ksize,
            v1=nrm((hidden, cin, ksize), 0.01),
            g1=0.5 + 0.1 * jnp.abs(jax.random.normal(next(keys), (hidden, 1, 1), jnp.float32)),
            b1=nrm((hidden,)),
            bn1_gamma=1.0 + nrm((hidden,)), bn1_beta=nrm((hidden,)),
            bn1_mean=nrm((hidden,)),
            bn1_var=0.5 + jax.random.uniform(next(keys), (hidden,), jnp.float32),
            v2=nrm((hidden, hidden, ksize), 0.01),
            g2=0.5 + 0.1 * jnp.abs(jax.random.normal(next(keys), (hidden, 1, 1), jnp.float32)),
            b2=nrm((hidden,)),
            bn2_gamma=1.0 + nrm((hidden,)), bn2_beta=nrm((hidden,)),
            bn2_mean=nrm((hidden,)),
            bn2_var=0.5 + jax.random.uniform(next(keys), (hidden,), jnp.float32),
        )
        if cin != hidden:
            blk['wd'] = nrm((hidden, cin), 0.01)
            blk['bd'] = nrm((hidden,))
        tcn.append(blk)

    n_att = len(LABELS) - 1
    heads = dict(
        w_pe=nrm((hidden,)), b_pe=nrm(()),
        att_w=nrm((n_att, hidden)), att_b=nrm((n_att, seq_len)),
        head_w=nrm((n_att, 2 * hidden)), head_b=nrm((n_att,)),
    )
    return dict(tcn=tcn, heads=heads)


def prepare_kernel_params(raw):
    """Fold weight_norm + eval BatchNorm into the conv weights/bias, reorder everything
    into the im2col / fused-head layouts consumed by the kernel."""
    eps = 1e-5

    def fold_conv_bn(v, g, b, gamma, beta, mean, var):
        # weight_norm (dim=0): W[o] = g[o] * v[o] / ||v[o]||_F
        norm = jnp.sqrt(jnp.sum(v * v, axis=(1, 2), keepdims=True))
        w = g * v / norm                                   # (Cout, Cin, k)
        scale = gamma / jnp.sqrt(var + eps)                # eval-mode BatchNorm fold
        shift = beta - mean * scale
        w_eff = w * scale[:, None, None]
        c_eff = b * scale + shift
        cout, cin, k = w_eff.shape
        # im2col layout (k*Cin, Cout): row block j = tap j (tap k-1 = current position).
        w_im = jnp.transpose(w_eff, (2, 1, 0)).reshape(k * cin, cout)
        return w_im, c_eff[None, :]

    tcn = []
    for blk in raw['tcn']:
        w1, c1 = fold_conv_bn(blk['v1'], blk['g1'], blk['b1'], blk['bn1_gamma'],
                              blk['bn1_beta'], blk['bn1_mean'], blk['bn1_var'])
        w2, c2 = fold_conv_bn(blk['v2'], blk['g2'], blk['b2'], blk['bn2_gamma'],
                              blk['bn2_beta'], blk['bn2_mean'], blk['bn2_var'])
        entry = dict(w1=w1, c1=c1, w2=w2, c2=c2,
                     ksize=blk['ksize'], dilation=blk['dilation'])
        if 'wd' in blk:
            entry['wd'] = blk['wd'].T                      # (Cin, Cout)
            entry['bd'] = blk['bd'][None, :]
        tcn.append(entry)

    h = raw['heads']
    F = h['w_pe'].shape[0]
    heads = dict(
        # (F, 2N+1): [attention weights | pe weight | att-pool half of head weights]
        wcomb=jnp.concatenate([h['att_w'].T, h['w_pe'][:, None], h['head_w'][:, F:].T],
                              axis=1),
        battT=h['att_b'].T,                    # (L, N)
        whmaxT=h['head_w'][:, :F].T,           # (F, N)  max-pool half
        bhead=h['head_b'][None, :],            # (1, N)
        bpe=h['b_pe'].reshape(1, 1),           # (1, 1) scalar -> SMEM
    )
    return dict(tcn=tcn, heads=heads)


# --------------------------------------------------------------------------------------
# Pure-JAX reference (eval mode) straight from the raw PyTorch-layout parameters
# --------------------------------------------------------------------------------------
def reference_forward(x, mask, raw):
    eps = 1e-5

    def fold_wn(v, g):
        norm = jnp.sqrt(jnp.sum(v * v, axis=(1, 2), keepdims=True))
        return g * v / norm

    def causal_conv(xin, w, b, dilation):
        B, L, _ = xin.shape
        k = w.shape[2]
        p = (k - 1) * dilation
        xp = jnp.pad(xin, ((0, 0), (p, 0), (0, 0)))
        out = b[None, None, :]
        for t in range(k):
            out = out + jnp.einsum('blc,oc->blo',
                                   xp[:, t * dilation:t * dilation + L, :], w[:, :, t])
        return out

    def bn(y, gamma, beta, mean, var):
        return (y - mean) / jnp.sqrt(var + eps) * gamma + beta

    h = x
    for blk in raw['tcn']:
        d = blk['dilation']
        y = causal_conv(h, fold_wn(blk['v1'], blk['g1']), blk['b1'], d)
        y = jnp.maximum(bn(y, blk['bn1_gamma'], blk['bn1_beta'], blk['bn1_mean'], blk['bn1_var']), 0.0)
        z = causal_conv(y, fold_wn(blk['v2'], blk['g2']), blk['b2'], d)
        z = jnp.maximum(bn(z, blk['bn2_gamma'], blk['bn2_beta'], blk['bn2_mean'], blk['bn2_var']), 0.0)
        res = jnp.einsum('blc,oc->blo', h, blk['wd']) + blk['bd'] if 'wd' in blk else h
        h = jnp.maximum(z + res, 0.0)

    hp = raw['heads']
    pe = jnp.einsum('blf,f->bl', h, hp['w_pe']) + hp['b_pe']     # (B, L)
    max_pool = jnp.max(h, axis=1)                                # (B, F)
    logits = {'pe_present_on_image': pe[:, :, None]}
    alphas = {}
    for i, label in enumerate(LABELS[1:]):
        e = jnp.tanh(jnp.einsum('blf,f->bl', h, hp['att_w'][i]) + hp['att_b'][i][None, :])
        a = jnp.exp(e) * mask
        a = a / jnp.sum(a, axis=1, keepdims=True) + 1e-10
        att_pool = jnp.einsum('bl,blf->bf', a, h)
        emb = jnp.concatenate([max_pool, att_pool], axis=1)      # (B, 2F)
        logits[label] = emb @ hp['head_w'][i][:, None] + hp['head_b'][i]
        alphas[label] = a
    return logits, alphas


if __name__ == "__main__":
    B, L = 2, 8                   # batch, seq_len
    INPUT_SIZE, HIDDEN = 16, 32   # input_size=16, diff=True -> 48 input features
    C_IN = INPUT_SIZE * 3
    KSIZE, LEVELS = 3, 2

    key = jax.random.PRNGKey(0)
    k_x, k_m, k_p = jax.random.split(key, 3)
    x = jax.random.normal(k_x, (B, L, C_IN), jnp.float32)
    mask = (jax.random.uniform(k_m, (B, L)) > 0.3).astype(jnp.float32)
    mask = mask.at[:, 0].set(1.0)     # every row keeps >=1 valid position (avoid 0/0)

    raw = init_params(k_p, C_IN, HIDDEN, L, KSIZE, LEVELS)
    kparams = prepare_kernel_params(raw)

    logits, alphas = pe_feature_sequential_net_forward(x, mask, kparams)
    jax.block_until_ready((logits, alphas))

    ref_logits, ref_alphas = reference_forward(x, mask, raw)

    assert logits['pe_present_on_image'].shape == (B, L, 1)
    for label in LABELS:
        assert jnp.allclose(logits[label], ref_logits[label], atol=1e-4, rtol=1e-4), label
    for label in LABELS[1:]:
        assert logits[label].shape == (B, 1)
        assert jnp.allclose(alphas[label], ref_alphas[label], atol=1e-4, rtol=1e-4), label

    print("KERNEL_OK")
</pallas_src>

<mosaic_0001>
module attributes {stable_mosaic.version = 11 : i64} {
  func.func @_fused_net_kernel(%arg0: i32, %arg1: memref<2x8x48xf32, #tpu.memory_space<vmem>>, %arg2: memref<2x8xf32, #tpu.memory_space<vmem>>, %arg3: memref<144x32xf32, #tpu.memory_space<vmem>>, %arg4: memref<1x32xf32, #tpu.memory_space<vmem>>, %arg5: memref<96x32xf32, #tpu.memory_space<vmem>>, %arg6: memref<1x32xf32, #tpu.memory_space<vmem>>, %arg7: memref<48x32xf32, #tpu.memory_space<vmem>>, %arg8: memref<1x32xf32, #tpu.memory_space<vmem>>, %arg9: memref<96x32xf32, #tpu.memory_space<vmem>>, %arg10: memref<1x32xf32, #tpu.memory_space<vmem>>, %arg11: memref<96x32xf32, #tpu.memory_space<vmem>>, %arg12: memref<1x32xf32, #tpu.memory_space<vmem>>, %arg13: memref<32x19xf32, #tpu.memory_space<vmem>>, %arg14: memref<8x9xf32, #tpu.memory_space<vmem>>, %arg15: memref<32x9xf32, #tpu.memory_space<vmem>>, %arg16: memref<1x9xf32, #tpu.memory_space<vmem>>, %arg17: memref<1x1xf32, #tpu.memory_space<smem>>, %arg18: memref<2x8x1xf32, #tpu.memory_space<vmem>>, %arg19: memref<2x9xf32, #tpu.memory_space<vmem>>, %arg20: memref<2x8x9xf32, #tpu.memory_space<vmem>>) attributes {dimension_semantics = [#tpu.dimension_semantics<parallel>], iteration_bounds = array<i64: 1>, scalar_prefetch = 0 : i64, scratch_operands = 0 : i64, tpu.core_type = #tpu.core_type<tc>, window_params = [{transform_indices = @transform_0, window_bounds = array<i64: 2, 8, 48>}, {transform_indices = @transform_1, window_bounds = array<i64: 2, 8>}, {pipeline_mode = #tpu.pipeline_mode<synchronous>, transform_indices = @transform_2, window_bounds = array<i64: 144, 32>}, {pipeline_mode = #tpu.pipeline_mode<synchronous>, transform_indices = @transform_3, window_bounds = array<i64: 1, 32>}, {pipeline_mode = #tpu.pipeline_mode<synchronous>, transform_indices = @transform_4, window_bounds = array<i64: 96, 32>}, {pipeline_mode = #tpu.pipeline_mode<synchronous>, transform_indices = @transform_5, window_bounds = array<i64: 1, 32>}, {pipeline_mode = #tpu.pipeline_mode<synchronous>, transform_indices = @transform_6, window_bounds = array<i64: 48, 32>}, {pipeline_mode = #tpu.pipeline_mode<synchronous>, transform_indices = @transform_7, window_bounds = array<i64: 1, 32>}, {pipeline_mode = #tpu.pipeline_mode<synchronous>, transform_indices = @transform_8, window_bounds = array<i64: 96, 32>}, {pipeline_mode = #tpu.pipeline_mode<synchronous>, transform_indices = @transform_9, window_bounds = array<i64: 1, 32>}, {pipeline_mode = #tpu.pipeline_mode<synchronous>, transform_indices = @transform_10, window_bounds = array<i64: 96, 32>}, {pipeline_mode = #tpu.pipeline_mode<synchronous>, transform_indices = @transform_11, window_bounds = array<i64: 1, 32>}, {pipeline_mode = #tpu.pipeline_mode<synchronous>, transform_indices = @transform_12, window_bounds = array<i64: 32, 19>}, {pipeline_mode = #tpu.pipeline_mode<synchronous>, transform_indices = @transform_13, window_bounds = array<i64: 8, 9>}, {pipeline_mode = #tpu.pipeline_mode<synchronous>, transform_indices = @transform_14, window_bounds = array<i64: 32, 9>}, {pipeline_mode = #tpu.pipeline_mode<synchronous>, transform_indices = @transform_15, window_bounds = array<i64: 1, 9>}, {transform_indices = @transform_16, window_bounds = array<i64: 1, 1>}, {transform_indices = @transform_17, window_bounds = array<i64: 2, 8, 1>}, {transform_indices = @transform_18, window_bounds = array<i64: 2, 9>}, {transform_indices = @transform_19, window_bounds = array<i64: 2, 8, 9>}]} {
    %c0 = arith.constant 0 : index
    %c0_0 = arith.constant 0 : index
    %c0_1 = arith.constant 0 : index
    %0 = vector.load %arg1[%c0, %c0_0, %c0_1] : memref<2x8x48xf32, #tpu.memory_space<vmem>>, vector<2x8x48xf32>
    %cst = arith.constant 0.000000e+00 : f32
    %1 = vector.broadcast %cst : f32 to vector<2x2x48xf32>
    %2 = tpu.concatenate %1, %0 in 1 : vector<2x2x48xf32>, vector<2x8x48xf32> -> vector<2x10x48xf32>
    %3 = vector.extract_strided_slice %2 {offsets = [0, 0, 0], sizes = [2, 8, 48], strides = [1, 1, 1]} : vector<2x10x48xf32> to vector<2x8x48xf32>
    %4 = vector.extract_strided_slice %2 {offsets = [0, 1, 0], sizes = [2, 8, 48], strides = [1, 1, 1]} : vector<2x10x48xf32> to vector<2x8x48xf32>
    %5 = vector.extract_strided_slice %2 {offsets = [0, 2, 0], sizes = [2, 8, 48], strides = [1, 1, 1]} : vector<2x10x48xf32> to vector<2x8x48xf32>
    %6 = tpu.concatenate %3, %4, %5 in 2 : vector<2x8x48xf32>, vector<2x8x48xf32>, vector<2x8x48xf32> -> vector<2x8x144xf32>
    %7 = vector.shape_cast %6 : vector<2x8x144xf32> to vector<16x144xf32>
    %c0_2 = arith.constant 0 : index
    %c0_3 = arith.constant 0 : index
    %8 = vector.load %arg3[%c0_2, %c0_3] : memref<144x32xf32, #tpu.memory_space<vmem>>, vector<144x32xf32>
    %cst_4 = arith.constant dense<0.000000e+00> : vector<16x32xf32>
    %9 = tpu.matmul %7, %8, %cst_4 {dimension_numbers = #tpu.dot_dimension_numbers<[1], [0], [0], [1], [0, 0, 1, 1], [], []>} : vector<16x144xf32>, vector<144x32xf32>, vector<16x32xf32> -> vector<16x32xf32>
    %c0_5 = arith.constant 0 : index
    %c0_6 = arith.constant 0 : index
    %10 = vector.load %arg4[%c0_5, %c0_6] : memref<1x32xf32, #tpu.memory_space<vmem>>, vector<1x32xf32>
    %11 = vector.broadcast %10 : vector<1x32xf32> to vector<16x32xf32>
    %12 = arith.addf %9, %11 : vector<16x32xf32>
    %cst_7 = arith.constant 0.000000e+00 : f32
    %13 = vector.broadcast %cst_7 : f32 to vector<16x32xf32>
    %14 = arith.maximumf %12, %13 : vector<16x32xf32>
    %15 = vector.shape_cast %14 : vector<16x32xf32> to vector<2x8x32xf32>
    %cst_8 = arith.constant 0.000000e+00 : f32
    %16 = vector.broadcast %cst_8 : f32 to vector<2x2x32xf32>
    %17 = tpu.concatenate %16, %15 in 1 : vector<2x2x32xf32>, vector<2x8x32xf32> -> vector<2x10x32xf32>
    %18 = vector.extract_strided_slice %17 {offsets = [0, 0, 0], sizes = [2, 8, 32], strides = [1, 1, 1]} : vector<2x10x32xf32> to vector<2x8x32xf32>
    %19 = vector.extract_strided_slice %17 {offsets = [0, 1, 0], sizes = [2, 8, 32], strides = [1, 1, 1]} : vector<2x10x32xf32> to vector<2x8x32xf32>
    %20 = vector.extract_strided_slice %17 {offsets = [0, 2, 0], sizes = [2, 8, 32], strides = [1, 1, 1]} : vector<2x10x32xf32> to vector<2x8x32xf32>
    %21 = tpu.concatenate %18, %19, %20 in 2 : vector<2x8x32xf32>, vector<2x8x32xf32>, vector<2x8x32xf32> -> vector<2x8x96xf32>
    %22 = vector.shape_cast %21 : vector<2x8x96xf32> to vector<16x96xf32>
    %c0_9 = arith.constant 0 : index
    %c0_10 = arith.constant 0 : index
    %23 = vector.load %arg5[%c0_9, %c0_10] : memref<96x32xf32, #tpu.memory_space<vmem>>, vector<96x32xf32>
    %cst_11 = arith.constant dense<0.000000e+00> : vector<16x32xf32>
    %24 = tpu.matmul %22, %23, %cst_11 {dimension_numbers = #tpu.dot_dimension_numbers<[1], [0], [0], [1], [0, 0, 1, 1], [], []>} : vector<16x96xf32>, vector<96x32xf32>, vector<16x32xf32> -> vector<16x32xf32>
    %c0_12 = arith.constant 0 : index
    %c0_13 = arith.constant 0 : index
    %25 = vector.load %arg6[%c0_12, %c0_13] : memref<1x32xf32, #tpu.memory_space<vmem>>, vector<1x32xf32>
    %26 = vector.broadcast %25 : vector<1x32xf32> to vector<16x32xf32>
    %27 = arith.addf %24, %26 : vector<16x32xf32>
    %cst_14 = arith.constant 0.000000e+00 : f32
    %28 = vector.broadcast %cst_14 : f32 to vector<16x32xf32>
    %29 = arith.maximumf %27, %28 : vector<16x32xf32>
    %30 = vector.shape_cast %29 : vector<16x32xf32> to vector<2x8x32xf32>
    %31 = vector.shape_cast %0 : vector<2x8x48xf32> to vector<16x48xf32>
    %c0_15 = arith.constant 0 : index
    %c0_16 = arith.constant 0 : index
    %32 = vector.load %arg7[%c0_15, %c0_16] : memref<48x32xf32, #tpu.memory_space<vmem>>, vector<48x32xf32>
    %cst_17 = arith.constant dense<0.000000e+00> : vector<16x32xf32>
    %33 = tpu.matmul %31, %32, %cst_17 {dimension_numbers = #tpu.dot_dimension_numbers<[1], [0], [0], [1], [0, 0, 1, 1], [], []>} : vector<16x48xf32>, vector<48x32xf32>, vector<16x32xf32> -> vector<16x32xf32>
    %c0_18 = arith.constant 0 : index
    %c0_19 = arith.constant 0 : index
    %34 = vector.load %arg8[%c0_18, %c0_19] : memref<1x32xf32, #tpu.memory_space<vmem>>, vector<1x32xf32>
    %35 = vector.broadcast %34 : vector<1x32xf32> to vector<16x32xf32>
    %36 = arith.addf %33, %35 : vector<16x32xf32>
    %37 = vector.shape_cast %36 : vector<16x32xf32> to vector<2x8x32xf32>
    %38 = arith.addf %30, %37 : vector<2x8x32xf32>
    %cst_20 = arith.constant 0.000000e+00 : f32
    %39 = vector.broadcast %cst_20 : f32 to vector<2x8x32xf32>
    %40 = arith.maximumf %38, %39 : vector<2x8x32xf32>
    %cst_21 = arith.constant 0.000000e+00 : f32
    %41 = vector.broadcast %cst_21 : f32 to vector<2x4x32xf32>
    %42 = tpu.concatenate %41, %40 in 1 : vector<2x4x32xf32>, vector<2x8x32xf32> -> vector<2x12x32xf32>
    %43 = vector.extract_strided_slice %42 {offsets = [0, 0, 0], sizes = [2, 8, 32], strides = [1, 1, 1]} : vector<2x12x32xf32> to vector<2x8x32xf32>
    %44 = vector.extract_strided_slice %42 {offsets = [0, 2, 0], sizes = [2, 8, 32], strides = [1, 1, 1]} : vector<2x12x32xf32> to vector<2x8x32xf32>
    %45 = vector.extract_strided_slice %42 {offsets = [0, 4, 0], sizes = [2, 8, 32], strides = [1, 1, 1]} : vector<2x12x32xf32> to vector<2x8x32xf32>
    %46 = tpu.concatenate %43, %44, %45 in 2 : vector<2x8x32xf32>, vector<2x8x32xf32>, vector<2x8x32xf32> -> vector<2x8x96xf32>
    %47 = vector.shape_cast %46 : vector<2x8x96xf32> to vector<16x96xf32>
    %c0_22 = arith.constant 0 : index
    %c0_23 = arith.constant 0 : index
    %48 = vector.load %arg9[%c0_22, %c0_23] : memref<96x32xf32, #tpu.memory_space<vmem>>, vector<96x32xf32>
    %cst_24 = arith.constant dense<0.000000e+00> : vector<16x32xf32>
    %49 = tpu.matmul %47, %48, %cst_24 {dimension_numbers = #tpu.dot_dimension_numbers<[1], [0], [0], [1], [0, 0, 1, 1], [], []>} : vector<16x96xf32>, vector<96x32xf32>, vector<16x32xf32> -> vector<16x32xf32>
    %c0_25 = arith.constant 0 : index
    %c0_26 = arith.constant 0 : index
    %50 = vector.load %arg10[%c0_25, %c0_26] : memref<1x32xf32, #tpu.memory_space<vmem>>, vector<1x32xf32>
    %51 = vector.broadcast %50 : vector<1x32xf32> to vector<16x32xf32>
    %52 = arith.addf %49, %51 : vector<16x32xf32>
    %cst_27 = arith.constant 0.000000e+00 : f32
    %53 = vector.broadcast %cst_27 : f32 to vector<16x32xf32>
    %54 = arith.maximumf %52, %53 : vector<16x32xf32>
    %55 = vector.shape_cast %54 : vector<16x32xf32> to vector<2x8x32xf32>
    %cst_28 = arith.constant 0.000000e+00 : f32
    %56 = vector.broadcast %cst_28 : f32 to vector<2x4x32xf32>
    %57 = tpu.concatenate %56, %55 in 1 : vector<2x4x32xf32>, vector<2x8x32xf32> -> vector<2x12x32xf32>
    %58 = vector.extract_strided_slice %57 {offsets = [0, 0, 0], sizes = [2, 8, 32], strides = [1, 1, 1]} : vector<2x12x32xf32> to vector<2x8x32xf32>
    %59 = vector.extract_strided_slice %57 {offsets = [0, 2, 0], sizes = [2, 8, 32], strides = [1, 1, 1]} : vector<2x12x32xf32> to vector<2x8x32xf32>
    %60 = vector.extract_strided_slice %57 {offsets = [0, 4, 0], sizes = [2, 8, 32], strides = [1, 1, 1]} : vector<2x12x32xf32> to vector<2x8x32xf32>
    %61 = tpu.concatenate %58, %59, %60 in 2 : vector<2x8x32xf32>, vector<2x8x32xf32>, vector<2x8x32xf32> -> vector<2x8x96xf32>
    %62 = vector.shape_cast %61 : vector<2x8x96xf32> to vector<16x96xf32>
    %c0_29 = arith.constant 0 : index
    %c0_30 = arith.constant 0 : index
    %63 = vector.load %arg11[%c0_29, %c0_30] : memref<96x32xf32, #tpu.memory_space<vmem>>, vector<96x32xf32>
    %cst_31 = arith.constant dense<0.000000e+00> : vector<16x32xf32>
    %64 = tpu.matmul %62, %63, %cst_31 {dimension_numbers = #tpu.dot_dimension_numbers<[1], [0], [0], [1], [0, 0, 1, 1], [], []>} : vector<16x96xf32>, vector<96x32xf32>, vector<16x32xf32> -> vector<16x32xf32>
    %c0_32 = arith.constant 0 : index
    %c0_33 = arith.constant 0 : index
    %65 = vector.load %arg12[%c0_32, %c0_33] : memref<1x32xf32, #tpu.memory_space<vmem>>, vector<1x32xf32>
    %66 = vector.broadcast %65 : vector<1x32xf32> to vector<16x32xf32>
    %67 = arith.addf %64, %66 : vector<16x32xf32>
    %cst_34 = arith.constant 0.000000e+00 : f32
    %68 = vector.broadcast %cst_34 : f32 to vector<16x32xf32>
    %69 = arith.maximumf %67, %68 : vector<16x32xf32>
    %70 = vector.shape_cast %69 : vector<16x32xf32> to vector<2x8x32xf32>
    %71 = arith.addf %70, %40 : vector<2x8x32xf32>
    %cst_35 = arith.constant 0.000000e+00 : f32
    %72 = vector.broadcast %cst_35 : f32 to vector<2x8x32xf32>
    %73 = arith.maximumf %71, %72 : vector<2x8x32xf32>
    %74 = vector.shape_cast %73 : vector<2x8x32xf32> to vector<16x32xf32>
    %c0_36 = arith.constant 0 : index
    %c0_37 = arith.constant 0 : index
    %75 = vector.load %arg13[%c0_36, %c0_37] : memref<32x19xf32, #tpu.memory_space<vmem>>, vector<32x19xf32>
    %cst_38 = arith.constant dense<0.000000e+00> : vector<16x19xf32>
    %76 = tpu.matmul %74, %75, %cst_38 {dimension_numbers = #tpu.dot_dimension_numbers<[1], [0], [0], [1], [0, 0, 1, 1], [], []>} : vector<16x32xf32>, vector<32x19xf32>, vector<16x19xf32> -> vector<16x19xf32>
    %77 = vector.shape_cast %76 : vector<16x19xf32> to vector<2x8x19xf32>
    %78 = vector.extract_strided_slice %77 {offsets = [0, 0, 9], sizes = [2, 8, 1], strides = [1, 1, 1]} : vector<2x8x19xf32> to vector<2x8x1xf32>
    %c0_39 = arith.constant 0 : index
    %c0_40 = arith.constant 0 : index
    %79 = memref.load %arg17[%c0_39, %c0_40] : memref<1x1xf32, #tpu.memory_space<smem>>
    %80 = vector.broadcast %79 : f32 to vector<2x8x1xf32>
    %81 = arith.addf %78, %80 : vector<2x8x1xf32>
    %c0_41 = arith.constant 0 : index
    %c0_42 = arith.constant 0 : index
    %c0_43 = arith.constant 0 : index
    %82 = vector.load %arg18[%c0_41, %c0_42, %c0_43] : memref<2x8x1xf32, #tpu.memory_space<vmem>>, vector<2x8x1xf32>
    tpu.vector_store %arg18[%c0_41, %c0_42, %c0_43], %81 {strides = array<i32>} : memref<2x8x1xf32, #tpu.memory_space<vmem>>, vector<2x8x1xf32>,
    %83 = vector.extract_strided_slice %77 {offsets = [0, 0, 0], sizes = [2, 8, 9], strides = [1, 1, 1]} : vector<2x8x19xf32> to vector<2x8x9xf32>
    %c0_44 = arith.constant 0 : index
    %c0_45 = arith.constant 0 : index
    %84 = vector.load %arg14[%c0_44, %c0_45] : memref<8x9xf32, #tpu.memory_space<vmem>>, vector<8x9xf32>
    %85 = vector.shape_cast %84 : vector<8x9xf32> to vector<1x8x9xf32>
    %86 = vector.broadcast %85 : vector<1x8x9xf32> to vector<2x8x9xf32>
    %87 = arith.addf %83, %86 : vector<2x8x9xf32>
    %88 = math.tanh %87 : vector<2x8x9xf32>
    %89 = math.exp %88 : vector<2x8x9xf32>
    %c0_46 = arith.constant 0 : index
    %c0_47 = arith.constant 0 : index
    %90 = vector.load %arg2[%c0_46, %c0_47] : memref<2x8xf32, #tpu.memory_space<vmem>>, vector<2x8xf32>
    %91 = vector.shape_cast %90 : vector<2x8xf32> to vector<2x8x1xf32>
    %92 = vector.broadcast %91 : vector<2x8x1xf32> to vector<2x8x9xf32>
    %93 = arith.mulf %89, %92 : vector<2x8x9xf32>
    %cst_48 = arith.constant dense<0.000000e+00> : vector<2x9xf32>
    %94 = vector.multi_reduction <add>, %93, %cst_48 [1] : vector<2x8x9xf32> to vector<2x9xf32>
    %95 = vector.shape_cast %94 : vector<2x9xf32> to vector<2x1x9xf32>
    %96 = vector.broadcast %95 : vector<2x1x9xf32> to vector<2x8x9xf32>
    %97 = arith.divf %93, %96 : vector<2x8x9xf32>
    %cst_49 = arith.constant 1.000000e-10 : f32
    %98 = vector.broadcast %cst_49 : f32 to vector<2x8x9xf32>
    %99 = arith.addf %97, %98 : vector<2x8x9xf32>
    %c0_50 = arith.constant 0 : index
    %c0_51 = arith.constant 0 : index
    %c0_52 = arith.constant 0 : index
    %100 = vector.load %arg20[%c0_50, %c0_51, %c0_52] : memref<2x8x9xf32, #tpu.memory_space<vmem>>, vector<2x8x9xf32>
    tpu.vector_store %arg20[%c0_50, %c0_51, %c0_52], %99 {strides = array<i32>} : memref<2x8x9xf32, #tpu.memory_space<vmem>>, vector<2x8x9xf32>,
    %101 = vector.extract_strided_slice %77 {offsets = [0, 0, 10], sizes = [2, 8, 9], strides = [1, 1, 1]} : vector<2x8x19xf32> to vector<2x8x9xf32>
    %102 = arith.mulf %99, %101 : vector<2x8x9xf32>
    %cst_53 = arith.constant dense<0.000000e+00> : vector<2x9xf32>
    %103 = vector.multi_reduction <add>, %102, %cst_53 [1] : vector<2x8x9xf32> to vector<2x9xf32>
    %cst_54 = arith.constant dense<0xFF800000> : vector<2x32xf32>
    %104 = vector.multi_reduction <maximumf>, %73, %cst_54 [1] : vector<2x8x32xf32> to vector<2x32xf32>
    %c0_55 = arith.constant 0 : index
    %c0_56 = arith.constant 0 : index
    %105 = vector.load %arg15[%c0_55, %c0_56] : memref<32x9xf32, #tpu.memory_space<vmem>>, vector<32x9xf32>
    %cst_57 = arith.constant dense<0.000000e+00> : vector<2x9xf32>
    %106 = tpu.matmul %104, %105, %cst_57 {dimension_numbers = #tpu.dot_dimension_numbers<[1], [0], [0], [1], [0, 0, 1, 1], [], []>} : vector<2x32xf32>, vector<32x9xf32>, vector<2x9xf32> -> vector<2x9xf32>
    %107 = arith.addf %106, %103 : vector<2x9xf32>
    %c0_58 = arith.constant 0 : index
    %c0_59 = arith.constant 0 : index
    %108 = vector.load %arg16[%c0_58, %c0_59] : memref<1x9xf32, #tpu.memory_space<vmem>>, vector<1x9xf32>
    %109 = vector.broadcast %108 : vector<1x9xf32> to vector<2x9xf32>
    %110 = arith.addf %107, %109 : vector<2x9xf32>
    %c0_60 = arith.constant 0 : index
    %c0_61 = arith.constant 0 : index
    %111 = vector.load %arg19[%c0_60, %c0_61] : memref<2x9xf32, #tpu.memory_space<vmem>>, vector<2x9xf32>
    tpu.vector_store %arg19[%c0_60, %c0_61], %110 {strides = array<i32>} : memref<2x9xf32, #tpu.memory_space<vmem>>, vector<2x9xf32>,
    return
  }
  func.func @transform_0(%arg0: i32) -> (i32, i32, i32) {
    %c0_i32 = arith.constant 0 : i32
    %c0_i32_0 = arith.constant 0 : i32
    %c0_i32_1 = arith.constant 0 : i32
    return %arg0, %c0_i32, %c0_i32_0 : i32, i32, i32
  }
  func.func @transform_1(%arg0: i32) -> (i32, i32) {
    %c0_i32 = arith.constant 0 : i32
    %c0_i32_0 = arith.constant 0 : i32
    return %arg0, %c0_i32 : i32, i32
  }
  func.func @transform_2(%arg0: i32) -> (i32, i32) {
    %c0_i32 = arith.constant 0 : i32
    %c0_i32_0 = arith.constant 0 : i32
    %c0_i32_1 = arith.constant 0 : i32
    return %c0_i32, %c0_i32_0 : i32, i32
  }
  func.func @transform_3(%arg0: i32) -> (i32, i32) {
    %c0_i32 = arith.constant 0 : i32
    %c0_i32_0 = arith.constant 0 : i32
    %c0_i32_1 = arith.constant 0 : i32
    return %c0_i32, %c0_i32_0 : i32, i32
  }
  func.func @transform_4(%arg0: i32) -> (i32, i32) {
    %c0_i32 = arith.constant 0 : i32
    %c0_i32_0 = arith.constant 0 : i32
    %c0_i32_1 = arith.constant 0 : i32
    return %c0_i32, %c0_i32_0 : i32, i32
  }
  func.func @transform_5(%arg0: i32) -> (i32, i32) {
    %c0_i32 = arith.constant 0 : i32
    %c0_i32_0 = arith.constant 0 : i32
    %c0_i32_1 = arith.constant 0 : i32
    return %c0_i32, %c0_i32_0 : i32, i32
  }
  func.func @transform_6(%arg0: i32) -> (i32, i32) {
    %c0_i32 = arith.constant 0 : i32
    %c0_i32_0 = arith.constant 0 : i32
    %c0_i32_1 = arith.constant 0 : i32
    return %c0_i32, %c0_i32_0 : i32, i32
  }
  func.func @transform_7(%arg0: i32) -> (i32, i32) {
    %c0_i32 = arith.constant 0 : i32
    %c0_i32_0 = arith.constant 0 : i32
    %c0_i32_1 = arith.constant 0 : i32
    return %c0_i32, %c0_i32_0 : i32, i32
  }
  func.func @transform_8(%arg0: i32) -> (i32, i32) {
    %c0_i32 = arith.constant 0 : i32
    %c0_i32_0 = arith.constant 0 : i32
    %c0_i32_1 = arith.constant 0 : i32
    return %c0_i32, %c0_i32_0 : i32, i32
  }
  func.func @transform_9(%arg0: i32) -> (i32, i32) {
    %c0_i32 = arith.constant 0 : i32
    %c0_i32_0 = arith.constant 0 : i32
    %c0_i32_1 = arith.constant 0 : i32
    return %c0_i32, %c0_i32_0 : i32, i32
  }
  func.func @transform_10(%arg0: i32) -> (i32, i32) {
    %c0_i32 = arith.constant 0 : i32
    %c0_i32_0 = arith.constant 0 : i32
    %c0_i32_1 = arith.constant 0 : i32
    return %c0_i32, %c0_i32_0 : i32, i32
  }
  func.func @transform_11(%arg0: i32) -> (i32, i32) {
    %c0_i32 = arith.constant 0 : i32
    %c0_i32_0 = arith.constant 0 : i32
    %c0_i32_1 = arith.constant 0 : i32
    return %c0_i32, %c0_i32_0 : i32, i32
  }
  func.func @transform_12(%arg0: i32) -> (i32, i32) {
    %c0_i32 = arith.constant 0 : i32
    %c0_i32_0 = arith.constant 0 : i32
    %c0_i32_1 = arith.constant 0 : i32
    return %c0_i32, %c0_i32_0 : i32, i32
  }
  func.func @transform_13(%arg0: i32) -> (i32, i32) {
    %c0_i32 = arith.constant 0 : i32
    %c0_i32_0 = arith.constant 0 : i32
    %c0_i32_1 = arith.constant 0 : i32
    return %c0_i32, %c0_i32_0 : i32, i32
  }
  func.func @transform_14(%arg0: i32) -> (i32, i32) {
    %c0_i32 = arith.constant 0 : i32
    %c0_i32_0 = arith.constant 0 : i32
    %c0_i32_1 = arith.constant 0 : i32
    return %c0_i32, %c0_i32_0 : i32, i32
  }
  func.func @transform_15(%arg0: i32) -> (i32, i32) {
    %c0_i32 = arith.constant 0 : i32
    %c0_i32_0 = arith.constant 0 : i32
    %c0_i32_1 = arith.constant 0 : i32
    return %c0_i32, %c0_i32_0 : i32, i32
  }
  func.func @transform_16(%arg0: i32) -> (i32, i32) {
    %c0_i32 = arith.constant 0 : i32
    %c0_i32_0 = arith.constant 0 : i32
    %c0_i32_1 = arith.constant 0 : i32
    return %c0_i32, %c0_i32_0 : i32, i32
  }
  func.func @transform_17(%arg0: i32) -> (i32, i32, i32) {
    %c0_i32 = arith.constant 0 : i32
    %c0_i32_0 = arith.constant 0 : i32
    %c0_i32_1 = arith.constant 0 : i32
    return %arg0, %c0_i32, %c0_i32_0 : i32, i32, i32
  }
  func.func @transform_18(%arg0: i32) -> (i32, i32) {
    %c0_i32 = arith.constant 0 : i32
    %c0_i32_0 = arith.constant 0 : i32
    return %arg0, %c0_i32 : i32, i32
  }
  func.func @transform_19(%arg0: i32) -> (i32, i32, i32) {
    %c0_i32 = arith.constant 0 : i32
    %c0_i32_0 = arith.constant 0 : i32
    %c0_i32_1 = arith.constant 0 : i32
    return %arg0, %c0_i32, %c0_i32_0 : i32, i32, i32
  }
}

</mosaic_0001>

<bundles_post_ra>
// kernel: tpu_custom_call.1
= control target key start
LH: loop header
LB: loop body
LE: loop exit
PB: predicated region body
PF: predicated region fallthrough
CT: control target
= control target key end

     0   :  { %s1947_s0 = inlined_call_operand.vmem [shape: f32[2,8,48], index: 0, kind: input, shape index: {}]   ;;  %s1948_s1 = inlined_call_operand.vmem [shape: f32[2,8], index: 1, kind: input, shape index: {}]   ;;  %s1949_s2 = inlined_call_operand.vmem [shape: f32[144,32], index: 2, kind: input, shape index: {}]   ;;  %s1950_s3 = inlined_call_operand.vmem [shape: f32[1,32], index: 3, kind: input, shape index: {}]   ;;  %s1951_s4 = inlined_call_operand.vmem [shape: f32[96,32], index: 4, kind: input, shape index: {}]   ;;  %s1952_s5 = inlined_call_operand.vmem [shape: f32[1,32], index: 5, kind: input, shape index: {}]   ;;  %s1953_s6 = inlined_call_operand.vmem [shape: f32[48,32], index: 6, kind: input, shape index: {}]   ;;  %s1954_s7 = inlined_call_operand.vmem [shape: f32[1,32], index: 7, kind: input, shape index: {}]   ;;  %s1955_s8 = inlined_call_operand.vmem [shape: f32[96,32], index: 8, kind: input, shape index: {}]   ;;  %s1956_s9 = inlined_call_operand.vmem [shape: f32[1,32], index: 9, kind: input, shape index: {}]   ;;  %s1957_s10 = inlined_call_operand.vmem [shape: f32[96,32], index: 10, kind: input, shape index: {}]   ;;  %s1958_s11 = inlined_call_operand.vmem [shape: f32[1,32], index: 11, kind: input, shape index: {}]   ;;  %s1959_s12 = inlined_call_operand.vmem [shape: f32[32,19], index: 12, kind: input, shape index: {}]   ;;  %s1960_s13 = inlined_call_operand.vmem [shape: f32[8,9], index: 13, kind: input, shape index: {}]   ;;  %s1961_s14 = inlined_call_operand.vmem [shape: f32[32,9], index: 14, kind: input, shape index: {}]   ;;  %s1962_s15 = inlined_call_operand.vmem [shape: f32[1,9], index: 15, kind: input, shape index: {}]   ;;  %s1963_s16 = inlined_call_operand.<no memory space> [shape: f32[1,1], index: 16, kind: input, shape index: {}]   ;;  %s1964_s17 = inlined_call_operand.vmem [shape: f32[2,8,1], index: 17, kind: output, shape index: {0}]   ;;  %s1965_s18 = inlined_call_operand.hbm [shape: f32[2,9], index: 18, kind: output, shape index: {1}]   ;;  %s1966_s19 = inlined_call_operand.hbm [shape: f32[2,8,9], index: 19, kind: output, shape index: {2}]  }
   0x1   :  { %1969 = sst [smem:[#allocation9_spill]] %s1947_s0 }
   0x2   :  { %1970 = sst [smem:[#allocation10_spill]] %s1948_s1 }
   0x3   :  { %1971 = sst [smem:[#allocation11_spill]] %s1949_s2 }
   0x4   :  { %1972 = sst [smem:[#allocation12_spill]] %s1950_s3 }
   0x5   :  { %26 = vsyncpa [#allocation4], 0  ;;  %s1973_s20 = sld [smem:[#allocation9_spill]]  ;;  %vm70_vm0 = vcmask 1041408   ;;  %s1974_s23 = sld [smem:[#allocation11_spill]]  ;;  %vm75_vm1 = vcmask 1046528  }
   0x6   :  { %v1448_v6 = vmov 0.0|0.0   ;;  %vm88_vm2 = vcmask 1045504   ;;  %s1449_s21 = smov 48  }
   0x7   :  { %1250 = vmatprep.subr.bf16.mxu0 %v1448_v6 }
   0xb   :  { %v1564_v0 = vld [vmem:[%s1973_s20] sm:$0xff]  ;;  %v1569_v1 = vld [vmem:[%s1973_s20 + $0x8] sm:$0xff]  ;;  %v109_v8 = vld [vmem:[%s1974_s23 + $0x10] sm:$0xff] }
   0xc   :  { %v66_v2 = vrot.slane %v1564_v0, 6  ;;  %v67_v3 = vrot.slane %v1569_v1, 6  ;;  %v107_v4 = vld [vmem:[%s1974_s23] sm:$0xff]  ;;  %v108_v5 = vld [vmem:[%s1974_s23 + $0x8] sm:$0xff]  ;;  %v110_v9 = vld [vmem:[%s1974_s23 + $0x18] sm:$0xff] }
   0xd   :  { %v1251_v7 = vpack.c.bf16 %v108_v5, %v107_v4  ;;  %v1254_v20 = vpack.c.bf16 %v110_v9, %v109_v8  ;;  %v111_v21 = vld [vmem:[%s1974_s23 + $0x20] sm:$0xff]  ;;  %v112_v22 = vld [vmem:[%s1974_s23 + $0x28] sm:$0xff] }
   0xe   :  { %v1587_v10 = vsel %vm70_vm0, 0.0, %v66_v2  ;;  %v77_v11 = vrot.slane %v66_v2, 1  ;;  %v1590_v12 = vsel %vm70_vm0, 0.0, %v67_v3  ;;  %v80_v13 = vrot.slane %v67_v3, 1 }
   0xf   :  { %v76_v14 = vrot.slane %v1587_v10, 1  ;;  %v79_v15 = vrot.slane %v1590_v12, 1  ;;  %v89_v16 = vrot.slane %v1587_v10, 2  ;;  %v90_v17 = vrot.slane %v66_v2, 2  ;;  %1252 = vmatpush1.bf16.msra.mxu0 %v1251_v7 }
  0x10   :  { %v92_v18 = vrot.slane %v1590_v12, 2  ;;  %v93_v19 = vrot.slane %v67_v3, 2  ;;  %1253 = vmatprep.subr.bf16.mxu0 %v1448_v6  ;;  %v1257_v27 = vpack.c.bf16 %v112_v22, %v111_v21 }
  0x11   :  { %v78_v23 = vsel %vm75_vm1, %v76_v14, %v77_v11  ;;  %v81_v24 = vsel %vm75_vm1, %v79_v15, %v80_v13  ;;  %v91_v25 = vsel %vm88_vm2, %v89_v16, %v90_v17 }
  0x12   :  { %82 = vrot.lane.b32.xlu0 %v78_v23, %s1449_s21  ;;  %84 = vrot.lane.b32.xlu1 %v81_v24, %s1449_s21  ;;  %v94_v26 = vsel %vm88_vm2, %v92_v18, %v93_v19 }
  0x13   :  { %1255 = vmatpush1.bf16.msra.mxu0 %v1254_v20 }
  0x14   :  { %27 = vsyncpa [#allocation6], 0  ;;  %1256 = vmatprep.subr.bf16.mxu0 %v1448_v6  ;;  %v113_v28 = vld [vmem:[%s1974_s23 + $0x30] sm:$0xff]  ;;  %v114_v29 = vld [vmem:[%s1974_s23 + $0x38] sm:$0xff]  ;;  %s1450_s25 = smov 96   ;;  %vm101_vm3 = vcmask 392192  }
  0x15   :  { %v1260_v30 = vpack.c.bf16 %v114_v29, %v113_v28  ;;  %v115_v31 = vld [vmem:[%s1974_s23 + $0x40] sm:$0xff]  ;;  %v116_v32 = vld [vmem:[%s1974_s23 + $0x48] sm:$0xff]  ;;  %v117_v34 = vld [vmem:[%s1974_s23 + $0x50] sm:$0xff]  ;;  %vm132_vm4 = vcmask 130048   ;;  %vm104_vm5 = vcmask 785408   ;;  %s1975_s24 = sld [smem:[#allocation12_spill]] }
  0x16   :  { %95 = vrot.lane.b32.xlu0 %v91_v25, %s1450_s25  ;;  %97 = vrot.lane.b32.xlu1 %v94_v26, %s1450_s25  ;;  %v1263_v33 = vpack.c.bf16 %v116_v32, %v115_v31  ;;  %v118_v35 = vld [vmem:[%s1974_s23 + $0x58] sm:$0xff]  ;;  %v119_v37 = vld [vmem:[%s1974_s23 + $0x60] sm:$0xff]  ;;  %s1452_s30 = smov 64   ;;  %vm248_vm6 = vcmask 261120   ;;  %vm251_vm7 = vcmask 523264   ;;  %vm458_vm8 = vcmask 1043456  }
  0x17   :  { %1258 = vmatpush1.bf16.msra.mxu0 %v1257_v27  ;;  %v1266_v36 = vpack.c.bf16 %v118_v35, %v117_v34  ;;  %v120_v38 = vld [vmem:[%s1974_s23 + $0x68] sm:$0xff]  ;;  %v121_v40 = vld [vmem:[%s1974_s23 + $0x70] sm:$0xff]  ;;  %v122_v41 = vld [vmem:[%s1974_s23 + $0x78] sm:$0xff]  ;;  %vm1453_vm9 = vmmov 0   ;;  %s1976_s25 = sld [smem:[#allocation10_spill]]  ;;  %vm930_vm10 = vcmask 1041409  }
  0x18   :  { %1259 = vmatprep.subr.bf16.mxu0 %v1448_v6  ;;  %v1269_v39 = vpack.c.bf16 %v120_v38, %v119_v37  ;;  %v1272_v42 = vpack.c.bf16 %v122_v41, %v121_v40  ;;  %v123_v43 = vld [vmem:[%s1974_s23 + $0x80] sm:$0xff]  ;;  %v124_v44 = vld [vmem:[%s1974_s23 + $0x88] sm:$0xff]  ;;  %v256_v56 = vld [vmem:[%s1951_s4 + $0x10] sm:$0xff]  ;;  %vm863_vm11 = vcmask 72704  }
  0x19   :  { %v1275_v45 = vpack.c.bf16 %v124_v44, %v123_v43  ;;  %v254_v54 = vld [vmem:[%s1951_s4] sm:$0xff]  ;;  %v255_v55 = vld [vmem:[%s1951_s4 + $0x8] sm:$0xff]  ;;  %v257_v58 = vld [vmem:[%s1951_s4 + $0x18] sm:$0xff] }
  0x1a   :  { %v1277_v57 = vpack.c.bf16 %v255_v55, %v254_v54  ;;  %v1281_v59 = vpack.c.bf16 %v257_v58, %v256_v56  ;;  %v258_v60 = vld [vmem:[%s1951_s4 + $0x20] sm:$0xff]  ;;  %v259_v61 = vld [vmem:[%s1951_s4 + $0x28] sm:$0xff]  ;;  %v260_v63 = vld [vmem:[%s1951_s4 + $0x30] sm:$0xff] }
  0x1b   :  { %1261 = vmatpush1.bf16.msra.mxu0 %v1260_v30  ;;  %v1285_v62 = vpack.c.bf16 %v259_v61, %v258_v60  ;;  %v261_v2 = vld [vmem:[%s1951_s4 + $0x38] sm:$0xff]  ;;  %v262_v4 = vld [vmem:[%s1951_s4 + $0x40] sm:$0xff]  ;;  %v263_v5 = vld [vmem:[%s1951_s4 + $0x48] sm:$0xff] }
  0x1c   :  { %1262 = vmatprep.subr.bf16.mxu0 %v1448_v6  ;;  %1278 = vmatprep.subr.bf16.mxu1 %v1277_v57  ;;  %v1289_v3 = vpack.c.bf16 %v261_v2, %v260_v63  ;;  %v1293_v7 = vpack.c.bf16 %v263_v5, %v262_v4  ;;  %v1052_v8 = vld [vmem:[%s1975_s24] ss:$0 sm:$0xff]  ;;  %v264_v9 = vld [vmem:[%s1951_s4 + $0x50] sm:$0xff]  ;;  %v357_v17 = vld [vmem:[%s1953_s6 + $0x8] sm:$0xff] }
  0x1d   :  { %1280 = vmatpush3.bf16.msra.mxu1 %v1277_v57  ;;  %v356_v16 = vld [vmem:[%s1953_s6] sm:$0xff]  ;;  %v358_v44 = vld [vmem:[%s1953_s6 + $0x10] sm:$0xff]  ;;  %v492_v54 = vld [vmem:[%s1955_s8 + $0x8] sm:$0xff] }
  0x1e   :  { %1282 = vmatprep.subr.bf16.mxu1 %v1281_v59  ;;  %v1301_v19 = vpack.c.bf16 %v357_v17, %v356_v16  ;;  %v494_v56 = vld [vmem:[%s1955_s8 + $0x18] sm:$0xff]  ;;  %v496_v58 = vld [vmem:[%s1955_s8 + $0x28] sm:$0xff]  ;;  %v497_v60 = vld [vmem:[%s1955_s8 + $0x30] sm:$0xff] }
  0x1f   :  { %1264 = vmatpush1.bf16.msra.mxu0 %v1263_v33  ;;  %v498_v61 = vld [vmem:[%s1955_s8 + $0x38] sm:$0xff]  ;;  %v499_v63 = vld [vmem:[%s1955_s8 + $0x40] sm:$0xff]  ;;  %v500_v2 = vld [vmem:[%s1955_s8 + $0x48] sm:$0xff] }
  0x20   :  { %1265 = vmatprep.subr.bf16.mxu0 %v1448_v6  ;;  %v502_v16 = vld [vmem:[%s1955_s8 + $0x58] sm:$0xff] }
  0x21   :  { %1284 = vmatpush3.bf16.msra.mxu1 %v1281_v59 }
  0x22   :  { %1286 = vmatprep.subr.bf16.mxu1 %v1285_v62 }
  0x23   :  { %1267 = vmatpush1.bf16.msra.mxu0 %v1266_v36 }
  0x24   :  { %1268 = vmatprep.subr.bf16.mxu0 %v1448_v6 }
  0x25   :  { %1288 = vmatpush3.bf16.msra.mxu1 %v1285_v62  ;;  %v1325_v62 = vpack.c.bf16 %v498_v61, %v497_v60  ;;  %v1061_v61 = vld [vmem:[%s1956_s9] ss:$0 sm:$0xff]  ;;  %s1455_s9 = smov 118  }
  0x26   :  { %1290 = vmatprep.subr.bf16.mxu1 %v1289_v3 }
  0x27   :  { %1270 = vmatpush1.bf16.msra.mxu0 %v1269_v39 }
  0x28   :  { %1271 = vmatprep.subr.bf16.mxu0 %v1448_v6 }
  0x29   :  { %1292 = vmatpush3.bf16.msra.mxu1 %v1289_v3  ;;  %v1329_v3 = vpack.c.bf16 %v500_v2, %v499_v63  ;;  %v642_v63 = vld [vmem:[%s1957_s10 + $0x58] sm:$0xff] }
  0x2a   :  { %1294 = vmatprep.subr.bf16.mxu1 %v1293_v7 }
  0x2b   :  { %1273 = vmatpush1.bf16.msra.mxu0 %v1272_v42 }
  0x2c   :  { %1274 = vmatprep.subr.bf16.mxu0 %v1448_v6 }
  0x2d   :  { %1296 = vmatpush3.bf16.msra.mxu1 %v1293_v7  ;;  %v1055_v7 = vld [vmem:[%s1952_s5] ss:$0 sm:$0xff] }
  0x2f   :  { %1276 = vmatpush1.bf16.msra.mxu0 %v1275_v45  ;;  %v359_v45 = vld [vmem:[%s1953_s6 + $0x18] sm:$0xff] }
  0x84   :  { %v83_v46 = vpop.permute.xlu0 %82  ;;  %v85_v47 = vpop.permute.xlu1 %84 }
  0x85   :  { %v102_v48 = vsel %vm101_vm3, %v1587_v10, %v83_v46  ;;  %v103_v51 = vsel %vm101_vm3, %v1590_v12, %v85_v47  ;;  %v265_v10 = vld [vmem:[%s1951_s4 + $0x58] sm:$0xff]  ;;  %s1451_s4 = smov 32  }
  0x86   :  { %v1297_v12 = vpack.c.bf16 %v265_v10, %v264_v9  ;;  %v1058_v10 = vld [vmem:[%s1954_s7] ss:$0 sm:$0xff] }
  0x88   :  { %v96_v49 = vpop.permute.xlu0 %95  ;;  %v98_v52 = vpop.permute.xlu1 %97  ;;  %1298 = vmatprep.subr.bf16.mxu1 %v1297_v12 }
  0x89   :  { %1053 = vmatprep.mubr.msk.f32.mxu0 %vm132_vm4, %v96_v49  ;;  %v105_v50 = vsel %vm104_vm5, %v102_v48, %v96_v49  ;;  %v106_v53 = vsel %vm104_vm5, %v103_v51, %v98_v52  ;;  %1300 = vmatpush3.bf16.msra.mxu1 %v1297_v12  ;;  %v1305_v48 = vpack.c.bf16 %v359_v45, %v358_v44  ;;  %v361_v51 = vld [vmem:[%s1953_s6 + $0x28] sm:$0xff] }
  0x8a   :  { %202 = vmatmul.mubr.f32.vlgmr.msra.gmra.mrb[0].mxu0 %v105_v50  ;;  %1302 = vmatprep.subr.bf16.mxu1 %v1301_v19  ;;  %v360_v50 = vld [vmem:[%s1953_s6 + $0x20] sm:$0xff] }
  0x8b   :  { %1054 = vmatprep.mubr.msk.f32.mxu0 %vm132_vm4, %v98_v52  ;;  %v1309_v52 = vpack.c.bf16 %v361_v51, %v360_v50  ;;  %v633_v50 = vld [vmem:[%s1957_s10 + $0x10] sm:$0xff] }
  0x8e   :  { %207 = vmatmul.mubr.f32.gmra.mrb[2].mxu0 %v106_v53  ;;  %v491_v53 = vld [vmem:[%s1955_s8] sm:$0xff] }
  0x8f   :  { %v1313_v55 = vpack.c.bf16 %v492_v54, %v491_v53  ;;  %v635_v54 = vld [vmem:[%s1957_s10 + $0x20] sm:$0xff] }
  0x91   :  { %1314 = vmatprep.subr.bf16.mxu0 %v1313_v55 }
  0x92   :  { %1316 = vmatpush3.bf16.msra.mxu0 %v1313_v55 }
 0x15d   :  { %v203_v11 = vpop.f32.mrb[0].mxu0 }
 0x15e   :  { %v204_v13 = vadd.f32 %v1052_v8, %v203_v11  ;;  %v205_v14 = vpop.f32.mrb[1].mxu0 }
 0x160   :  { %v212_v15 = vmax.f32 %v204_v13, 0.0 }
 0x161   :  { %v208_v18 = vpop.f32.mrb[2].mxu0 }
 0x162   :  { %v216_v20 = vrot.slane %v212_v15, 6  ;;  %v209_v21 = vadd.f32 %v1052_v8, %v208_v18  ;;  %v210_v22 = vpop.f32.mrb[3].mxu0  ;;  %v501_v15 = vld [vmem:[%s1955_s8 + $0x50] sm:$0xff] }
 0x164   :  { %v220_v23 = vsel %vm70_vm0, 0.0, %v216_v20  ;;  %v225_v24 = vrot.slane %v216_v20, 1  ;;  %v213_v25 = vmax.f32 %v209_v21, 0.0  ;;  %v237_v28 = vrot.slane %v216_v20, 2 }
 0x165   :  { %v224_v26 = vrot.slane %v220_v23, 1  ;;  %v236_v30 = vrot.slane %v220_v23, 2 }
 0x166   :  { %v217_v27 = vrot.slane %v213_v25, 6 }
 0x167   :  { %v226_v29 = vsel %vm75_vm1, %v224_v26, %v225_v24  ;;  %v238_v36 = vsel %vm88_vm2, %v236_v30, %v237_v28 }
 0x168   :  { %v221_v31 = vsel %vm70_vm0, 0.0, %v217_v27  ;;  %v228_v32 = vrot.slane %v217_v27, 1  ;;  %230 = vrot.lane.b32.xlu0 %v226_v29, %s1451_s4  ;;  %v240_v34 = vrot.slane %v217_v27, 2 }
 0x169   :  { %v227_v33 = vrot.slane %v221_v31, 1  ;;  %v239_v37 = vrot.slane %v221_v31, 2 }
 0x16b   :  { %v229_v35 = vsel %vm75_vm1, %v227_v33, %v228_v32  ;;  %v241_v38 = vsel %vm88_vm2, %v239_v37, %v240_v34 }
 0x16c   :  { %232 = vrot.lane.b32.xlu1 %v229_v35, %s1451_s4  ;;  %242 = vrot.lane.b32.xlu0 %v238_v36, %s1452_s30 }
 0x170   :  { %244 = vrot.lane.b32.xlu1 %v241_v38, %s1452_s30 }
 0x1da   :  { %v231_v39 = vpop.permute.xlu0 %230 }
 0x1db   :  { %v249_v40 = vsel %vm248_vm6, %v220_v23, %v231_v39 }
 0x1de   :  { %v233_v41 = vpop.permute.xlu1 %232  ;;  %v243_v42 = vpop.permute.xlu0 %242 }
 0x1df   :  { %v252_v43 = vsel %vm251_vm7, %v249_v40, %v243_v42  ;;  %v250_v46 = vsel %vm248_vm6, %v221_v31, %v233_v41 }
 0x1e0   :  { %1156 = vmatprep.mubr.msk.f32.mxu1 %vm104_vm5, %v252_v43 }
 0x1e2   :  { %v245_v47 = vpop.permute.xlu1 %244 }
 0x1e3   :  { %v253_v49 = vsel %vm251_vm7, %v250_v46, %v245_v47 }
 0x1e4   :  { %1157 = vmatmul.mubr.msk.f32.vlgmr.msra.gmra.mrb[0].mxu1 %vm104_vm5, %v253_v49  ;;  %v632_v49 = vld [vmem:[%s1957_s10 + $0x8] sm:$0xff] }
 0x1e5   :  { %1304 = vmatpush3.bf16.msra.mxu1 %v1301_v19  ;;  %1171 = vmatprep.mubr.msk.f32.mxu1 %vm101_vm3, %v1564_v0  ;;  %v493_v0 = vld [vmem:[%s1955_s8 + $0x10] sm:$0xff]  ;;  %v1333_v19 = vpack.c.bf16 %v502_v16, %v501_v15 }
 0x1e6   :  { %1306 = vmatprep.subr.bf16.mxu1 %v1305_v48  ;;  %v1317_v57 = vpack.c.bf16 %v494_v56, %v493_v0  ;;  %v636_v0 = vld [vmem:[%s1957_s10 + $0x28] sm:$0xff]  ;;  %v637_v56 = vld [vmem:[%s1957_s10 + $0x30] sm:$0xff] }
 0x1e7   :  { %v1345_v55 = vpack.c.bf16 %v636_v0, %v635_v54 }
 0x1e8   :  { %1318 = vmatprep.subr.bf16.mxu0 %v1317_v57 }
 0x1e9   :  { %1308 = vmatpush3.bf16.msra.mxu1 %v1305_v48  ;;  %1320 = vmatpush3.bf16.msra.mxu0 %v1317_v57  ;;  %v631_v48 = vld [vmem:[%s1957_s10] sm:$0xff]  ;;  %v638_v57 = vld [vmem:[%s1957_s10 + $0x38] sm:$0xff] }
 0x1ea   :  { %1310 = vmatprep.subr.bf16.mxu1 %v1309_v52  ;;  %v1337_v51 = vpack.c.bf16 %v632_v49, %v631_v48  ;;  %v927_v48 = vld [vmem:[%s1961_s14 + $0x18] sm:$0xff] }
 0x1ed   :  { %1312 = vmatpush3.bf16.msra.mxu1 %v1309_v52  ;;  %v634_v52 = vld [vmem:[%s1957_s10 + $0x18] sm:$0xff] }
 0x1ee   :  { %v1341_v53 = vpack.c.bf16 %v634_v52, %v633_v50  ;;  %1338 = vmatprep.subr.bf16.mxu1 %v1337_v51  ;;  %v1454_v50 = vmov 0.0  }
 0x1f0   :  { %1172 = vmatmul.mubr.msk.f32.vlgmr.msra.gmra.mrb[2].mxu1 %vm101_vm3, %v1569_v1  ;;  %v495_v1 = vld [vmem:[%s1955_s8 + $0x20] sm:$0xff] }
 0x1f1   :  { %v1321_v59 = vpack.c.bf16 %v496_v58, %v495_v1  ;;  %1340 = vmatpush3.bf16.msra.mxu1 %v1337_v51  ;;  %v1349_v1 = vpack.c.bf16 %v638_v57, %v637_v56  ;;  %v639_v58 = vld [vmem:[%s1957_s10 + $0x40] sm:$0xff]  ;;  %v847_v51 = vlaneseq }
 0x1f2   :  { %1342 = vmatprep.subr.bf16.mxu1 %v1341_v53  ;;  %v1064_v56 = vld [vmem:[%s1958_s11] ss:$0 sm:$0xff] }
 0x1f3   :  { %1322 = vmatprep.subr.bf16.mxu0 %v1321_v59  ;;  %v848_v52 = vshrl.u32 %v847_v51, 7 }
 0x1f4   :  { %1324 = vmatpush3.bf16.msra.mxu0 %v1321_v59  ;;  %v640_v59 = vld [vmem:[%s1957_s10 + $0x48] sm:$0xff] }
 0x1f5   :  { %1326 = vmatprep.subr.bf16.mxu0 %v1325_v62  ;;  %1344 = vmatpush3.bf16.msra.mxu1 %v1341_v53  ;;  %v1353_v60 = vpack.c.bf16 %v640_v59, %v639_v58  ;;  %v846_v53 = vld [vmem:[%s1976_s25] sm:$0x3]  ;;  %v849_v54 = vsub.s32 0, %v848_v52 }
 0x1f6   :  { %1346 = vmatprep.subr.bf16.mxu1 %v1345_v55 }
 0x1f8   :  { %1328 = vmatpush3.bf16.msra.mxu0 %v1325_v62  ;;  %v641_v62 = vld [vmem:[%s1957_s10 + $0x50] sm:$0xff]  ;;  %s1456_s10 = smov 119  }
 0x1f9   :  { %1330 = vmatprep.subr.bf16.mxu0 %v1329_v3  ;;  %1348 = vmatpush3.bf16.msra.mxu1 %v1345_v55  ;;  %v850_v55 = vrot.slane %v846_v53, %v849_v54 }
 0x1fa   :  { %1350 = vmatprep.subr.bf16.mxu1 %v1349_v1 }
 0x1fc   :  { %1332 = vmatpush3.bf16.msra.mxu0 %v1329_v3  ;;  %v1357_v3 = vpack.c.bf16 %v642_v63, %v641_v62 }
 0x1fd   :  { %1334 = vmatprep.subr.bf16.mxu0 %v1333_v19  ;;  %1352 = vmatpush3.bf16.msra.mxu1 %v1349_v1 }
 0x1fe   :  { %1354 = vmatprep.subr.bf16.mxu1 %v1353_v60 }
 0x200   :  { %1336 = vmatpush3.bf16.msra.mxu0 %v1333_v19 }
 0x201   :  { %1356 = vmatpush3.bf16.msra.mxu1 %v1353_v60 }
 0x202   :  { %1358 = vmatprep.subr.bf16.mxu1 %v1357_v3 }
 0x205   :  { %1360 = vmatpush3.bf16.msra.mxu1 %v1357_v3 }
 0x206   :  { %1369 = vmatprep.subr.bf16.mxu1 %v1448_v6 }
 0x2b7   :  { %v1158_v4 = vpop.f32.mrb[0].mxu1 }
 0x2b8   :  { %v345_v5 = vpop.f32.mrb[1].mxu1  ;;  %v351_v8 = vadd.f32 %v1158_v4, %v1055_v7 }
 0x2b9   :  { %v346_v9 = vadd.f32 %v1055_v7, %v345_v5 }
 0x2ba   :  { %v355_v12 = vmax.f32 %v351_v8, 0.0 }
 0x2bb   :  { %v354_v17 = vmax.f32 %v346_v9, 0.0 }
 0x2c3   :  { %v1173_v11 = vpop.f32.mrb[2].mxu1 }
 0x2c4   :  { %v445_v13 = vadd.f32 %v1173_v11, %v1058_v10  ;;  %v439_v14 = vpop.f32.mrb[3].mxu1 }
 0x2c5   :  { %v440_v18 = vadd.f32 %v1058_v10, %v439_v14 }
 0x2c6   :  { %v1775_v20 = vadd.f32 %v445_v13, %v355_v12 }
 0x2c7   :  { %v1777_v21 = vadd.f32 %v440_v18, %v354_v17 }
 0x2c8   :  { %v451_v22 = vmax.f32 %v1775_v20, 0.0 }
 0x2c9   :  { %v450_v23 = vmax.f32 %v1777_v21, 0.0 }
 0x2ca   :  { %v455_v24 = vrot.slane %v451_v22, 4 }
 0x2cb   :  { %v454_v25 = vrot.slane %v450_v23, 4 }
 0x2cc   :  { %v460_v26 = vsel %vm458_vm8, 0.0, %v455_v24  ;;  %v467_v27 = vrot.slane %v455_v24, 2  ;;  %v479_v34 = vrot.slane %v455_v24, 4 }
 0x2cd   :  { %v466_v28 = vrot.slane %v460_v26, 2  ;;  %v459_v29 = vsel %vm458_vm8, 0.0, %v454_v25  ;;  %v464_v30 = vrot.slane %v454_v25, 2  ;;  %v478_v33 = vrot.slane %v460_v26, 4 }
 0x2ce   :  { %v463_v31 = vrot.slane %v459_v29, 2  ;;  %v475_v36 = vrot.slane %v459_v29, 4  ;;  %v476_v37 = vrot.slane %v454_v25, 4 }
 0x2cf   :  { %v468_v32 = vsel %vm88_vm2, %v466_v28, %v467_v27  ;;  %v480_v38 = vsel %vm458_vm8, %v478_v33, %v479_v34 }
 0x2d0   :  { %471 = vrot.lane.b32.xlu1 %v468_v32, %s1451_s4  ;;  %v465_v35 = vsel %vm88_vm2, %v463_v31, %v464_v30  ;;  %v477_v39 = vsel %vm458_vm8, %v475_v36, %v476_v37 }
 0x2d1   :  { %469 = vrot.lane.b32.xlu0 %v465_v35, %s1451_s4 }
 0x2d4   :  { %483 = vrot.lane.b32.xlu1 %v480_v38, %s1452_s30  ;;  %v737_v38 = vld [vmem:[%s1959_s12] sm:$0xff] }
 0x2d5   :  { %481 = vrot.lane.b32.xlu0 %v477_v39, %s1452_s30  ;;  %v738_v39 = vld [vmem:[%s1959_s12 + $0x8] sm:$0xff] }
 0x342   :  { %v472_v40 = vpop.permute.xlu1 %471 }
 0x343   :  { %v470_v41 = vpop.permute.xlu0 %469  ;;  %v488_v45 = vsel %vm248_vm6, %v460_v26, %v472_v40  ;;  %v1361_v40 = vpack.c.bf16 %v738_v39, %v737_v38 }
 0x344   :  { %v487_v43 = vsel %vm248_vm6, %v459_v29, %v470_v41  ;;  %v739_v41 = vld [vmem:[%s1959_s12 + $0x10] sm:$0xff] }
 0x345   :  { %1362 = vmatprep.subr.bf16.mxu0 %v1361_v40 }
 0x346   :  { %v484_v42 = vpop.permute.xlu1 %483 }
 0x347   :  { %v482_v44 = vpop.permute.xlu0 %481  ;;  %v490_v47 = vsel %vm251_vm7, %v488_v45, %v484_v42  ;;  %v740_v42 = vld [vmem:[%s1959_s12 + $0x18] sm:$0xff]  ;;  %v925_v45 = vld [vmem:[%s1961_s14 + $0x8] sm:$0xff] }
 0x348   :  { %v489_v46 = vsel %vm251_vm7, %v487_v43, %v482_v44  ;;  %v1365_v43 = vpack.c.bf16 %v740_v42, %v739_v41  ;;  %v924_v44 = vld [vmem:[%s1961_s14] sm:$0xff] }
 0x349   :  { %1198 = vmatprep.mubr.msk.f32.mxu0 %vm104_vm5, %v489_v46  ;;  %v1370_v46 = vpack.c.bf16 %v925_v45, %v924_v44 }
 0x34a   :  { %1199 = vmatmul.mubr.msk.f32.vlgmr.msra.gmra.mrb[4].mxu0 %vm104_vm5, %v490_v47  ;;  %v926_v47 = vld [vmem:[%s1961_s14 + $0x10] sm:$0xff] }
 0x34b   :  { %1364 = vmatpush3.bf16.msra.mxu0 %v1361_v40  ;;  %v1373_v49 = vpack.c.bf16 %v927_v48, %v926_v47 }
 0x34c   :  { %1366 = vmatprep.subr.bf16.mxu0 %v1365_v43 }
 0x34f   :  { %1368 = vmatpush3.bf16.msra.mxu0 %v1365_v43 }
 0x41d   :  { %v1200_v2 = vpop.f32.mrb[4].mxu0 }
 0x41e   :  { %v588_v4 = vadd.f32 %v1200_v2, %v1061_v61  ;;  %v582_v5 = vpop.f32.mrb[5].mxu0 }
 0x41f   :  { %v583_v7 = vadd.f32 %v1061_v61, %v582_v5 }
 0x420   :  { %v592_v8 = vmax.f32 %v588_v4, 0.0 }
 0x421   :  { %v591_v9 = vmax.f32 %v583_v7, 0.0 }
 0x422   :  { %v596_v10 = vrot.slane %v592_v8, 4 }
 0x423   :  { %v595_v11 = vrot.slane %v591_v9, 4 }
 0x424   :  { %v600_v12 = vsel %vm458_vm8, 0.0, %v596_v10  ;;  %v607_v13 = vrot.slane %v596_v10, 2  ;;  %v619_v18 = vrot.slane %v596_v10, 4 }
 0x425   :  { %v599_v14 = vsel %vm458_vm8, 0.0, %v595_v11  ;;  %v604_v15 = vrot.slane %v595_v11, 2  ;;  %v606_v16 = vrot.slane %v600_v12, 2  ;;  %v618_v24 = vrot.slane %v600_v12, 4 }
 0x426   :  { %v603_v17 = vrot.slane %v599_v14, 2  ;;  %v616_v25 = vrot.slane %v595_v11, 4  ;;  %v615_v27 = vrot.slane %v599_v14, 4 }
 0x427   :  { %v608_v19 = vsel %vm88_vm2, %v606_v16, %v607_v13  ;;  %v620_v28 = vsel %vm458_vm8, %v618_v24, %v619_v18  ;;  %v837_v16 = vld [vmem:[%s1960_s13] sm:$0xff]  ;;  %v823_v18 = vstv %s1963_s16  ;;  %s1457_s13 = smov [#allocation5]  }
 0x428   :  { %611 = vrot.lane.b32.xlu1 %v608_v19, %s1451_s4  ;;  %v605_v26 = vsel %vm88_vm2, %v603_v17, %v604_v15  ;;  %v617_v29 = vsel %vm458_vm8, %v615_v27, %v616_v25  ;;  %s1035_s16 = sshll.u32 %s1457_s13, 4  ;;  %s1036_s16 = int_to_ptr.vmem [resolvable:$true] %s1035_s16 }
 0x429   :  { %609 = vrot.lane.b32.xlu0 %v605_v26, %s1451_s4  ;;  %s1400_s4 = scalar_lea.vmem %s1036_s16, 256  ;;  %p1405_p1 = scmp.lt.s32.totalorder %s1036_s16, %s1036_s16 }
 0x42a   :  { %p1401_p0 = scmp.ne.s32.totalorder %s1036_s16, %s1400_s4  ;;  %p1406_p2 = scmp.lt.s32.totalorder %s1400_s4, %s1400_s4 }
 0x42c   :  { %623 = vrot.lane.b32.xlu1 %v620_v28, %s1452_s30  ;;  %p1407_p3 = por %p1406_p2, %p1405_p1 }
 0x42d   :  { %621 = vrot.lane.b32.xlu0 %v617_v29, %s1452_s30 }
 0x42e   :  { %p1408_p4 = pnand %p1407_p3, %p1401_p0 }
 0x431   :  { %852 = vbcast.lane.b32.xlu0 %v850_v55, 256 }
 0x49a   :  { %v612_v30 = vpop.permute.xlu1 %611 }
 0x49b   :  { %v610_v31 = vpop.permute.xlu0 %609  ;;  %v628_v35 = vsel %vm248_vm6, %v600_v12, %v612_v30 }
 0x49c   :  { %v627_v33 = vsel %vm248_vm6, %v599_v14, %v610_v31 }
 0x49e   :  { %v624_v32 = vpop.permute.xlu1 %623 }
 0x49f   :  { %v622_v34 = vpop.permute.xlu0 %621  ;;  %v630_v37 = vsel %vm251_vm7, %v628_v35, %v624_v32 }
 0x4a0   :  { %v629_v36 = vsel %vm251_vm7, %v627_v33, %v622_v34 }
 0x4a1   :  { %1225 = vmatprep.mubr.msk.f32.mxu1 %vm104_vm5, %v629_v36 }
 0x4a2   :  { %1226 = vmatmul.mubr.msk.f32.vlgmr.msra.gmra.mrb[4].mxu1 %vm104_vm5, %v630_v37 }
 0x4a3   :  { %1371 = vmatpush3.bf16.msra.mxu1 %v1370_v46  ;;  %1247 = vmatprep.mubr.msk.f32.mxu1 %vm1453_vm9, %v1454_v50  ;;  %v853_v35 = vpop.permute.xlu0 %852 }
 0x4a4   :  { %1372 = vmatprep.subr.bf16.mxu1 %v1448_v6  ;;  %v856_v6 = vsub.s32 1, %v848_v52 }
 0x4a6   :  { %v857_v0 = vrot.slane %v846_v53, %v856_v6 }
 0x4a7   :  { %1374 = vmatpush3.bf16.msra.mxu1 %v1373_v49 }
 0x4a8   :  { %859 = vbcast.lane.b32.xlu1 %v857_v0, 256 }
 0x51a   :  { %v860_v34 = vpop.permute.xlu1 %859 }
 0x575   :  { %v1227_v57 = vpop.f32.mrb[4].mxu1 }
 0x576   :  { %v728_v1 = vadd.f32 %v1227_v57, %v1064_v56  ;;  %v722_v58 = vpop.f32.mrb[5].mxu1 }
 0x577   :  { %v723_v59 = vadd.f32 %v1064_v56, %v722_v58 }
 0x578   :  { %v732_v60 = vmax.f32 %v728_v1, 0.0 }
 0x579   :  { %v731_v61 = vmax.f32 %v723_v59, 0.0 }
 0x57a   :  { %v734_v62 = vadd.f32 %v732_v60, %v451_v22 }
 0x57b   :  { %v733_v63 = vadd.f32 %v731_v61, %v450_v23 }
 0x57c   :  { %v736_v2 = vmax.f32 %v734_v62, 0.0 }
 0x57d   :  { %v735_v3 = vmax.f32 %v733_v63, 0.0 }
 0x57e   :  { %v917_v4 = vsel %vm248_vm6, %v736_v2, -inf }
 0x57f   :  { %v918_v5 = vrot.slane %v917_v4, 4  ;;  %v910_v7 = vsel %vm248_vm6, %v735_v3, -inf  ;;  %1236 = vmatprep.mubr.msk.f32.mxu0 %vm248_vm6, %v735_v3 }
 0x580   :  { %v911_v8 = vrot.slane %v910_v7, 4  ;;  %1237 = vmatmul.mubr.msk.f32.vlgmr.msra.gmra.mrb[6].mxu0 %vm248_vm6, %v736_v2 }
 0x581   :  { %v919_v9 = vmax.f32 %v917_v4, %v918_v5 }
 0x582   :  { %v912_v10 = vmax.f32 %v910_v7, %v911_v8 }
 0x583   :  { %v920_v11 = vrot.slane %v919_v9, 2 }
 0x584   :  { %v913_v20 = vrot.slane %v912_v10, 2 }
 0x585   :  { %v921_v22 = vmax.f32 %v919_v9, %v920_v11 }
 0x586   :  { %v914_v12 = vmax.f32 %v912_v10, %v913_v20 }
 0x587   :  { %v922_v21 = vrot.slane %v921_v22, 1 }
 0x588   :  { %v915_v23 = vrot.slane %v914_v12, 1 }
 0x589   :  { %v923_v13 = vmax.f32 %v921_v22, %v922_v21 }
 0x58a   :  { %v916_v14 = vmax.f32 %v914_v12, %v915_v23 }
 0x58c   :  { %v931_v15 = vsel %vm930_vm10, %v923_v13, %v916_v14 }
 0x58d   :  { %1248 = vmatmul.mubr.msk.f32.vlgmr.msra.gmra.mrb[6].mxu1 %vm248_vm6, %v931_v15 }
 0x653   :  { %v1238_v17 = vpop.f32.mrb[6].mxu0 }
 0x654   :  { %890 = vrot.lane.b32.xlu1 %v1238_v17, %s1455_s9  ;;  %v813_v19 = vpop.f32.mrb[7].mxu0  ;;  %v839_v24 = vadd.f32 %v1238_v17, %v837_v16  ;;  %v825_v26 = vadd.f32 %v1238_v17, %v823_v18 }
 0x655   :  { %v838_v25 = vadd.f32 %v837_v16, %v813_v19  ;;  %888 = vrot.lane.b32.xlu0 %v813_v19, %s1455_s9  ;;  %v824_v27 = vadd.f32 %v823_v18, %v813_v19 }
 0x656   :  { %1388 = vtanh.f32 %v839_v24 }
 0x657   :  { %1390 = vtanh.f32 %v838_v25 }
 0x658   :  { %830 = vrot.lane.b32.xlu1 %v825_v26, %s1456_s10 }
 0x659   :  { %828 = vrot.lane.b32.xlu0 %v824_v27, %s1456_s10 }
 0x660   :  { %v1389_v28 = vpop.eup %1388  ;;  %v1904_v29 = vpop.f32.mrb[6].mxu1 }
 0x661   :  { %v1391_v30 = vpop.eup %1390  ;;  %v844_v31 = vmul.f32 1.442695, %v1389_v28  ;;  %v1249_v32 = vpop.f32.mrb[7].mxu1 }
 0x662   :  { %v842_v33 = vmul.f32 1.442695, %v1391_v30 }
 0x663   :  { %1392 = vpow2.f32 %v844_v31 }
 0x664   :  { %1394 = vpow2.f32 %v842_v33 }
 0x66d   :  { %v1393_v36 = vpop.eup %1392 }
 0x66e   :  { %v1395_v37 = vpop.eup %1394  ;;  %v862_v38 = vmul.f32 %v1393_v36, %v860_v34 }
 0x66f   :  { %v861_v39 = vmul.f32 %v1395_v37, %v853_v35 }
 0x670   :  { %v871_v40 = vsel %vm863_vm11, %v862_v38, 0.0 }
 0x671   :  { %v872_v41 = vrot.slane %v871_v40, 4  ;;  %v864_v42 = vsel %vm863_vm11, %v861_v39, 0.0 }
 0x672   :  { %v865_v43 = vrot.slane %v864_v42, 4 }
 0x673   :  { %v873_v44 = vadd.f32 %v872_v41, %v871_v40 }
 0x674   :  { %v866_v45 = vadd.f32 %v865_v43, %v864_v42 }
 0x675   :  { %v874_v46 = vrot.slane %v873_v44, 2 }
 0x676   :  { %v867_v47 = vrot.slane %v866_v45, 2 }
 0x677   :  { %v875_v48 = vadd.f32 %v874_v46, %v873_v44 }
 0x678   :  { %v868_v49 = vadd.f32 %v867_v47, %v866_v45 }
 0x679   :  { %v876_v50 = vrot.slane %v875_v48, 1 }
 0x67a   :  { %v869_v51 = vrot.slane %v868_v49, 1 }
 0x67b   :  { %v877_v52 = vadd.f32 %v876_v50, %v875_v48 }
 0x67c   :  { %v870_v53 = vadd.f32 %v869_v51, %v868_v49 }
 0x67d   :  { %1396 = vrcp.f32 %v877_v52 }
 0x67e   :  { %1398 = vrcp.f32 %v870_v53 }
 0x687   :  { %v1397_v6 = vpop.eup %1396 }
 0x688   :  { %v1399_v54 = vpop.eup %1398  ;;  %v881_v0 = vmul.f32 %v1397_v6, %v862_v38 }
 0x689   :  { %v879_v55 = vmul.f32 %v1399_v54, %v861_v39 }
 0x68a   :  { %v883_v56 = vadd.f32 1e-10, %v881_v0 }
 0x68b   :  { %v882_v57 = vadd.f32 1e-10, %v879_v55 }
 0x68c   :  { %885 = vst.msk [vmem:[#allocation5 + $0x8] sm:$0xff] %vm863_vm11, %v883_v56 }
 0x68d   :  { %884 = vst.msk [vmem:[#allocation5] sm:$0xff] %vm863_vm11, %v882_v57 }
 0x68e   :  { %1411 = shalt.err (!%p1408_p4)
}
 0x68f   :  { %s1412_s29 = scalar_lea.hbm %s1966_s19, 256 }
 0x690   :  { %p1413_p5 = scmp.ne.s32.totalorder %s1966_s19, %s1412_s29  ;;  %p1416_p6 = scmp.lt.u32.totalorder %s1412_s29, %s1966_s19 }
 0x692   :  { %p1418_p7 = pnand %p1416_p6, %p1413_p5 }
 0x694   :  { %1421 = shalt.err (!%p1418_p7)
}
 0x695   :  { %s1458_s1 = smov 128   ;;  %s1459_s22 = smov 8   ;;  %vm834_vm12 = vcmask 7168   ;;  %v1070_v13 = vld [vmem:[%s1962_s15] ss:$0 sm:$0xff]  ;;  %vm1016_vm13 = vcmask 66560  }
 0x696   :  { %1041 = dma.vmem_to_hbm [thread:$0]  %s1036_s16, 256, %s1966_s19, [#allocation6], %s1458_s1, %s1458_s1, %s1459_s22  }
 0x697   :  { %s1460_s3 = smov [#allocation3]  }
 0x698   :  { %s1026_s26 = sshll.u32 %s1460_s3, 4  ;;  %s1027_s26 = int_to_ptr.vmem [resolvable:$true] %s1026_s26 }
 0x699   :  { %p1427_p9 = scmp.lt.s32.totalorder %s1027_s26, %s1027_s26 }
 0x6c6   :  { %v891_v1 = vpop.permute.xlu1 %890 }
 0x6c7   :  { %v895_v58 = vmul.f32 %v891_v1, %v883_v56  ;;  %v889_v59 = vpop.permute.xlu0 %888 }
 0x6c8   :  { %v894_v60 = vmul.f32 %v889_v59, %v882_v57 }
 0x6c9   :  { %v903_v61 = vsel %vm863_vm11, %v895_v58, 0.0 }
 0x6ca   :  { %v904_v62 = vrot.slane %v903_v61, 4  ;;  %v896_v63 = vsel %vm863_vm11, %v894_v60, 0.0  ;;  %v831_v2 = vpop.permute.xlu1 %830 }
 0x6cb   :  { %v897_v3 = vrot.slane %v896_v63, 4  ;;  %836 = vst.msk [vmem:[%s1964_s17 + $0x8] sm:$0xff] %vm834_vm12, %v831_v2  ;;  %v829_v4 = vpop.permute.xlu0 %828 }
 0x6cc   :  { %v905_v5 = vadd.f32 %v904_v62, %v903_v61  ;;  %835 = vst.msk [vmem:[%s1964_s17] sm:$0xff] %vm834_vm12, %v829_v4  ;;  %s1422_s17 = scalar_lea.vmem %s1027_s26, 32 }
 0x6cd   :  { %v898_v7 = vadd.f32 %v897_v3, %v896_v63  ;;  %p1423_p8 = scmp.ne.s32.totalorder %s1027_s26, %s1422_s17  ;;  %p1428_p10 = scmp.lt.s32.totalorder %s1422_s17, %s1422_s17 }
 0x6ce   :  { %v906_v8 = vrot.slane %v905_v5, 2 }
 0x6cf   :  { %v899_v9 = vrot.slane %v898_v7, 2  ;;  %p1429_p11 = por %p1428_p10, %p1427_p9 }
 0x6d0   :  { %v907_v10 = vadd.f32 %v906_v8, %v905_v5 }
 0x6d1   :  { %v900_v11 = vadd.f32 %v899_v9, %v898_v7  ;;  %p1430_p12 = pnand %p1429_p11, %p1423_p8 }
 0x6d2   :  { %v908_v20 = vrot.slane %v907_v10, 1 }
 0x6d3   :  { %v901_v22 = vrot.slane %v900_v11, 1 }
 0x6d4   :  { %v909_v12 = vadd.f32 %v908_v20, %v907_v10 }
 0x6d5   :  { %v902_v21 = vadd.f32 %v901_v22, %v900_v11 }
 0x6d7   :  { %v934_v23 = vsel %vm930_vm10, %v909_v12, %v902_v21 }
 0x6d8   :  { %v1005_v14 = vadd.f32 %v1904_v29, %v934_v23 }
 0x6da   :  { %v1015_v15 = vadd.f32 %v1070_v13, %v1005_v14 }
 0x6dc   :  { %1017 = vst.msk [vmem:[#allocation3] sm:$0x3] %vm1016_vm13, %v1015_v15 }
 0x6dd   :  { %1433 = shalt.err (!%p1430_p12)
}
 0x6de   :  { %s1434_s27 = scalar_lea.hbm %s1965_s18, 32 }
 0x6df   :  { %p1435_p13 = scmp.ne.s32.totalorder %s1965_s18, %s1434_s27  ;;  %p1438_p0 = scmp.lt.u32.totalorder %s1434_s27, %s1965_s18 }
 0x6e1   :  { %p1440_p1 = pnand %p1438_p0, %p1435_p13 }
 0x6e3   :  { %1443 = shalt.err (!%p1440_p1)
}
 0x6e4   :  { %1029 = dma.vmem_to_hbm [thread:$0]  %s1027_s26, 32, %s1965_s18, [#allocation4]  }
 0x6e5   :  { %1444 = dma.done.wait [#allocation4], 32  }
 0x6e6   :  { %1445 = vsyncadd [#allocation4], 4294967264 }
 0x6e7   :  { %1446 = dma.done.wait [#allocation6], 256  }
 0x6e8   :  { %1447 = vsyncadd [#allocation6], 4294967040 }
 0x6e9   :  { %1050 = vsyncpa [#allocation4], 1 }
 0x6ea   :  { %1051 = vsyncpa [#allocation6], 1 }

</bundles_post_ra>
